<compile_context>
chip_gen: v6e
topology: v6e:2x2x1
jax: 0.10.0
libtpu: 0.0.40
codegen_flags: <defaults>
</compile_context>

<pallas_src>
import functools
import math

import jax
import jax.numpy as jnp
from jax import lax
from jax.experimental import pallas as pl
from jax.experimental.pallas import tpu as pltpu


# ---------------------------------------------------------------------------
# Kernels
# ---------------------------------------------------------------------------
def _ln_channels_last_kernel(x_ref, g_ref, b_ref, o_ref, *, eps):
    # x_ref: (tm, C) block; normalize each row over the lane (C) axis.
    x = x_ref[...].astype(jnp.float32)
    u = jnp.mean(x, axis=-1, keepdims=True)
    d = x - u
    s = jnp.mean(d * d, axis=-1, keepdims=True)          # biased variance (two-pass)
    y = d * lax.rsqrt(s + eps)                           # single EUP rsqrt, no divide
    o_ref[...] = (y * g_ref[...] + b_ref[...]).astype(o_ref.dtype)   # g/b already f32


def _ln_channels_first_kernel(x_ref, g_ref, b_ref, o_ref, *, eps):
    # x_ref: (1, C, t) block of the native (N, C, H*W) layout.  Reduce over C;
    # spatial stays on the lane dimension -> lane-dense loads/stores, no
    # transposes anywhere.
    x = x_ref[0].astype(jnp.float32)                     # (C, t)
    u = jnp.mean(x, axis=0, keepdims=True)               # (1, t)
    d = x - u
    s = jnp.mean(d * d, axis=0, keepdims=True)           # biased variance
    y = d * lax.rsqrt(s + eps)
    o_ref[0] = (y * g_ref[...] + b_ref[...]).astype(o_ref.dtype)     # g/b: (C, 1) f32


# ---------------------------------------------------------------------------
# Tile picker (dtype- and C-aware VMEM budget; cdiv-friendly)
# ---------------------------------------------------------------------------
# Per-step VMEM ~= 4 * tile * C * dtype_bytes   (double-buffered in + out blocks)
#               + ~3 * tile * C * 4             (f32 compute temps / spills)
# 14 MiB keeps this under v5e's 16 MiB default scoped VMEM; we also raise the
# limit to 32 MiB for headroom (fine on v5e/v6e/v7x).
_VMEM_STEP_BUDGET = 14 * 1024 * 1024
_VMEM_LIMIT_BYTES = 32 * 1024 * 1024


def _pick_tile(n, c, dtype_bytes, unit, budget=_VMEM_STEP_BUDGET, min_steps=4):
    """Tile length along the non-reduced axis (rows for channels_last, lanes
    for channels_first).  Returned tile is a multiple of `unit` (8 or 128) or
    the full extent `n`, so the (8, 128) BlockSpec constraint always holds."""
    per_row = c * (4 * dtype_bytes + 12)
    cap = max(unit, (budget // per_row) // unit * unit)
    if n <= cap:
        # Whole axis fits in one block.  Split anyway when it is big enough so
        # the grid has a few steps (DMA pipelining + work for both v7x cores).
        if n >= 2 * unit * min_steps:
            t = -(-n // min_steps)                 # cdiv(n, min_steps)
            t = -(-t // unit) * unit               # round up to the unit
            return min(t, cap)
        return n                                   # full extent (always legal)
    return cap                                     # biggest budget-aligned tile


# ---------------------------------------------------------------------------
# Public wrapper: matches LayerNorm.forward
# ---------------------------------------------------------------------------
def layer_norm(x, weight, bias, eps=1e-6, data_format="channels_last"):
    if data_format not in ("channels_last", "channels_first"):
        raise NotImplementedError(data_format)

    db = jnp.dtype(x.dtype).itemsize
    w32 = weight.astype(jnp.float32)
    b32 = bias.astype(jnp.float32)

    if data_format == "channels_last":
        C = x.shape[-1]
        lead = x.shape[:-1]
        M = math.prod(lead) if lead else 1
        x2 = x.reshape(M, C)                              # free (contiguous)
        tm = _pick_tile(M, C, db, unit=8)
        # TODO(synk): for C not a multiple of 128 (e.g. ConvNeXt C=96/192) the
        # stores are lane-masked; packing k rows per block (last dim k*C) would
        # recover the masked store lanes.  Correctness is unaffected as-is.
        out = pl.pallas_call(
            functools.partial(_ln_channels_last_kernel, eps=eps),
            out_shape=jax.ShapeDtypeStruct((M, C), x.dtype),
            grid_spec=pltpu.PrefetchScalarGridSpec(
                num_scalar_prefetch=0,
                grid=(pl.cdiv(M, tm),),
                in_specs=[
                    pl.BlockSpec((tm, C), lambda i: (i, 0)),
                    pl.BlockSpec((1, C), lambda i: (0, 0)),
                    pl.BlockSpec((1, C), lambda i: (0, 0)),
                ],
                out_specs=pl.BlockSpec((tm, C), lambda i: (i, 0)),
            ),
            compiler_params=pltpu.CompilerParams(
                dimension_semantics=("parallel",),
                vmem_limit_bytes=_VMEM_LIMIT_BYTES),
            cost_estimate=pl.CostEstimate(
                flops=7 * M * C,
                transcendentals=M,
                bytes_accessed=2 * M * C * db + 8 * C),
        )(x2, w32.reshape(1, C), b32.reshape(1, C))
        return out.reshape(x.shape)

    # channels_first: (N, C, *spatial), normalize over axis 1 in native layout.
    N, C = x.shape[0], x.shape[1]
    HW = math.prod(x.shape[2:]) if x.ndim > 2 else 1
    x3 = x.reshape(N, C, HW)                              # free (contiguous)
    t = _pick_tile(HW, C, db, unit=128)
    out = pl.pallas_call(
        functools.partial(_ln_channels_first_kernel, eps=eps),
        out_shape=jax.ShapeDtypeStruct((N, C, HW), x.dtype),
        grid_spec=pltpu.PrefetchScalarGridSpec(
            num_scalar_prefetch=0,
            grid=(N, pl.cdiv(HW, t)),
            in_specs=[
                pl.BlockSpec((1, C, t), lambda n, j: (n, 0, j)),
                pl.BlockSpec((C, 1), lambda n, j: (0, 0)),
                pl.BlockSpec((C, 1), lambda n, j: (0, 0)),
            ],
            out_specs=pl.BlockSpec((1, C, t), lambda n, j: (n, 0, j)),
        ),
        compiler_params=pltpu.CompilerParams(
            dimension_semantics=("parallel", "parallel"),
            vmem_limit_bytes=_VMEM_LIMIT_BYTES),
        cost_estimate=pl.CostEstimate(
            flops=7 * N * C * HW,
            transcendentals=N * HW,
            bytes_accessed=2 * N * C * HW * db + 8 * C),
    )(x3, w32.reshape(C, 1), b32.reshape(C, 1))
    return out.reshape(x.shape)


# ---------------------------------------------------------------------------
# Pure-JAX reference (mirrors the PyTorch forward) for verification
# ---------------------------------------------------------------------------
def reference_layer_norm(x, weight, bias, eps=1e-6, data_format="channels_last"):
    xf = x.astype(jnp.float32)
    if data_format == "channels_last":
        u = xf.mean(-1, keepdims=True)
        s = ((xf - u) ** 2).mean(-1, keepdims=True)
        y = (xf - u) / jnp.sqrt(s + eps)
        return (weight * y + bias).astype(x.dtype)
    u = xf.mean(1, keepdims=True)
    s = ((xf - u) ** 2).mean(1, keepdims=True)
    y = (xf - u) / jnp.sqrt(s + eps)
    bshape = (1, -1) + (1,) * (x.ndim - 2)
    return (weight.reshape(bshape) * y + bias.reshape(bshape)).astype(x.dtype)


def _check(name, out, ref, atol=1e-4, rtol=1e-4):
    assert out.shape == ref.shape, (name, out.shape, ref.shape)
    err = float(jnp.max(jnp.abs(out.astype(jnp.float32) - ref.astype(jnp.float32))))
    assert jnp.allclose(out.astype(jnp.float32), ref.astype(jnp.float32),
                        atol=atol, rtol=rtol), (name, err)


# ---------------------------------------------------------------------------
# Self-test
# ---------------------------------------------------------------------------
if __name__ == "__main__":
    key = jax.random.PRNGKey(0)
    k1, k2, k3, k4, k5, k6 = jax.random.split(key, 6)

    C = 128
    weight = 1.0 + 0.1 * jax.random.normal(k2, (C,), jnp.float32)
    bias = 0.1 * jax.random.normal(k3, (C,), jnp.float32)

    # --- channels_first on native NCHW (2, 128, 16, 16) ---------------------
    x_cf = jax.random.normal(k1, (2, C, 16, 16), jnp.float32)
    out_cf = jax.block_until_ready(
        layer_norm(x_cf, weight, bias, eps=1e-6, data_format="channels_first"))
    _check("channels_first", out_cf,
           reference_layer_norm(x_cf, weight, bias, 1e-6, "channels_first"))

    # --- channels_last on NHWC (2, 16, 16, 128) ------------------------------
    x_cl = jax.random.normal(k4, (2, 16, 16, C), jnp.float32)
    out_cl = jax.block_until_ready(
        layer_norm(x_cl, weight, bias, eps=1e-6, data_format="channels_last"))
    _check("channels_last", out_cl,
           reference_layer_norm(x_cl, weight, bias, 1e-6, "channels_last"))

    # --- bf16 activations (f32 statistics in-kernel) -------------------------
    x_bf = x_cf.astype(jnp.bfloat16)
    out_bf = jax.block_until_ready(
        layer_norm(x_bf, weight, bias, eps=1e-6, data_format="channels_first"))
    assert out_bf.dtype == jnp.bfloat16
    _check("bf16 channels_first", out_bf,
           reference_layer_norm(x_bf, weight, bias, 1e-6, "channels_first"),
           atol=5e-2, rtol=5e-2)

    # --- awkward shapes: exercise cdiv grids / partial edge blocks -----------
    # channels_last, M = 2*15*13 = 390 rows -> 4 blocks of 104 (last partial).
    x_odd = jax.random.normal(k5, (2, 15, 13, C), jnp.float32)
    out_odd = jax.block_until_ready(
        layer_norm(x_odd, weight, bias, eps=1e-6, data_format="channels_last"))
    _check("channels_last odd", out_odd,
           reference_layer_norm(x_odd, weight, bias, 1e-6, "channels_last"))

    # channels_first, HW = 1600 -> lane tiles of 512 (last block partial).
    C2 = 32
    w2 = 1.0 + 0.1 * jax.random.normal(k2, (C2,), jnp.float32)
    b2 = 0.1 * jax.random.normal(k3, (C2,), jnp.float32)
    x_big = jax.random.normal(k6, (2, C2, 40, 40), jnp.float32)
    out_big = jax.block_until_ready(
        layer_norm(x_big, w2, b2, eps=1e-6, data_format="channels_first"))
    _check("channels_first partial-lane", out_big,
           reference_layer_norm(x_big, w2, b2, 1e-6, "channels_first"))

    print("KERNEL_OK")
</pallas_src>

<mosaic_0001>
module attributes {stable_mosaic.version = 11 : i64} {
  func.func @_ln_channels_first_kernel(%arg0: i32, %arg1: i32, %arg2: memref<1x128x256xf32, #tpu.memory_space<vmem>>, %arg3: memref<128x1xf32, #tpu.memory_space<vmem>>, %arg4: memref<128x1xf32, #tpu.memory_space<vmem>>, %arg5: memref<1x128x256xf32, #tpu.memory_space<vmem>>) attributes {dimension_semantics = [#tpu.dimension_semantics<parallel>, #tpu.dimension_semantics<parallel>], iteration_bounds = array<i64: 2, 1>, scalar_prefetch = 0 : i64, scratch_operands = 0 : i64, tpu.core_type = #tpu.core_type<tc>, window_params = [{transform_indices = @transform_0, window_bounds = array<i64: 1, 128, 256>}, {pipeline_mode = #tpu.pipeline_mode<synchronous>, transform_indices = @transform_1, window_bounds = array<i64: 128, 1>}, {pipeline_mode = #tpu.pipeline_mode<synchronous>, transform_indices = @transform_2, window_bounds = array<i64: 128, 1>}, {transform_indices = @transform_3, window_bounds = array<i64: 1, 128, 256>}]} {
    %c0 = arith.constant 0 : index
    %c0_0 = arith.constant 0 : index
    %c0_1 = arith.constant 0 : index
    %0 = vector.load %arg2[%c0, %c0_0, %c0_1] : memref<1x128x256xf32, #tpu.memory_space<vmem>>, vector<1x128x256xf32>
    %1 = vector.shape_cast %0 : vector<1x128x256xf32> to vector<128x256xf32>
    %cst = arith.constant dense<0.000000e+00> : vector<256xf32>
    %2 = vector.multi_reduction <add>, %1, %cst [0] : vector<128x256xf32> to vector<256xf32>
    %3 = vector.shape_cast %2 : vector<256xf32> to vector<1x256xf32>
    %cst_2 = arith.constant 1.280000e+02 : f32
    %4 = vector.broadcast %cst_2 : f32 to vector<1x256xf32>
    %5 = arith.divf %3, %4 : vector<1x256xf32>
    %6 = vector.broadcast %5 : vector<1x256xf32> to vector<128x256xf32>
    %7 = arith.subf %1, %6 : vector<128x256xf32>
    %8 = arith.mulf %7, %7 : vector<128x256xf32>
    %cst_3 = arith.constant dense<0.000000e+00> : vector<256xf32>
    %9 = vector.multi_reduction <add>, %8, %cst_3 [0] : vector<128x256xf32> to vector<256xf32>
    %10 = vector.shape_cast %9 : vector<256xf32> to vector<1x256xf32>
    %cst_4 = arith.constant 1.280000e+02 : f32
    %11 = vector.broadcast %cst_4 : f32 to vector<1x256xf32>
    %12 = arith.divf %10, %11 : vector<1x256xf32>
    %cst_5 = arith.constant 9.99999997E-7 : f32
    %13 = vector.broadcast %cst_5 : f32 to vector<1x256xf32>
    %14 = arith.addf %12, %13 : vector<1x256xf32>
    %15 = math.rsqrt %14 : vector<1x256xf32>
    %16 = vector.broadcast %15 : vector<1x256xf32> to vector<128x256xf32>
    %17 = arith.mulf %7, %16 : vector<128x256xf32>
    %c0_6 = arith.constant 0 : index
    %c0_7 = arith.constant 0 : index
    %18 = vector.load %arg3[%c0_6, %c0_7] : memref<128x1xf32, #tpu.memory_space<vmem>>, vector<128x1xf32>
    %19 = vector.broadcast %18 : vector<128x1xf32> to vector<128x256xf32>
    %20 = arith.mulf %17, %19 : vector<128x256xf32>
    %c0_8 = arith.constant 0 : index
    %c0_9 = arith.constant 0 : index
    %21 = vector.load %arg4[%c0_8, %c0_9] : memref<128x1xf32, #tpu.memory_space<vmem>>, vector<128x1xf32>
    %22 = vector.broadcast %21 : vector<128x1xf32> to vector<128x256xf32>
    %23 = arith.addf %20, %22 : vector<128x256xf32>
    %c0_10 = arith.constant 0 : index
    %c0_11 = arith.constant 0 : index
    %c0_12 = arith.constant 0 : index
    %24 = vector.load %arg5[%c0_10, %c0_11, %c0_12] : memref<1x128x256xf32, #tpu.memory_space<vmem>>, vector<1x128x256xf32>
    %25 = vector.shape_cast %24 : vector<1x128x256xf32> to vector<128x256xf32>
    %26 = vector.shape_cast %23 : vector<128x256xf32> to vector<1x128x256xf32>
    tpu.vector_store %arg5[%c0_10, %c0_11, %c0_12], %26 {strides = array<i32>} : memref<1x128x256xf32, #tpu.memory_space<vmem>>, vector<1x128x256xf32>,
    return
  }
  func.func @transform_0(%arg0: i32, %arg1: i32) -> (i32, i32, i32) {
    %c0_i32 = arith.constant 0 : i32
    %c0_i32_0 = arith.constant 0 : i32
    return %arg0, %c0_i32, %arg1 : i32, i32, i32
  }
  func.func @transform_1(%arg0: i32, %arg1: i32) -> (i32, i32) {
    %c0_i32 = arith.constant 0 : i32
    %c0_i32_0 = arith.constant 0 : i32
    %c0_i32_1 = arith.constant 0 : i32
    return %c0_i32, %c0_i32_0 : i32, i32
  }
  func.func @transform_2(%arg0: i32, %arg1: i32) -> (i32, i32) {
    %c0_i32 = arith.constant 0 : i32
    %c0_i32_0 = arith.constant 0 : i32
    %c0_i32_1 = arith.constant 0 : i32
    return %c0_i32, %c0_i32_0 : i32, i32
  }
  func.func @transform_3(%arg0: i32, %arg1: i32) -> (i32, i32, i32) {
    %c0_i32 = arith.constant 0 : i32
    %c0_i32_0 = arith.constant 0 : i32
    return %arg0, %c0_i32, %arg1 : i32, i32, i32
  }
}

</mosaic_0001>

<bundles_post_ra>
// kernel: tpu_custom_call.1
= control target key start
LH: loop header
LB: loop body
LE: loop exit
PB: predicated region body
PF: predicated region fallthrough
CT: control target
= control target key end

     0   :  { %8 = vsyncpa [#allocation3], 0  ;;  %s1763_s0 = inlined_call_operand.hbm [shape: f32[2,128,256], index: 0, kind: input, shape index: {}]   ;;  %s1764_s1 = inlined_call_operand.vmem [shape: f32[128,1], index: 1, kind: input, shape index: {}]   ;;  %s1765_s2 = inlined_call_operand.vmem [shape: f32[128,1], index: 2, kind: input, shape index: {}]   ;;  %s1766_s3 = inlined_call_operand.hbm [shape: f32[2,128,256], index: 3, kind: output, shape index: {}]  }
   0x1   :  { %10 = vsyncpa [#allocation3 + $0x1], 0 }
   0x2   :  { %11 = vsyncpa [#allocation4], 0 }
   0x3   :  { %13 = vsyncpa [#allocation4 + $0x1], 0  ;;  %s1048_s12 = smov 0   ;;  %s1050_s13 = smov 0  }
   0x4   :  { %s1052_s14 = smov 0   ;;  %s1054_s15 = smov 0  }
   0x5   :  { %s1056_s16 = smov 0   ;;  %s1058_s17 = smov 0  }
   0x6 LB: > { %s821_s18 = sadd.s32 4294967295, %s1019_s17   ;;  %s822_s19 = sadd.s32 4294967294, %s1019_s17   ;;  %s1019_s17 = sphi %s1058_s17, %s19_s17   ;;  %s1015_s16 = sphi %s1056_s16, %s1783_s16   ;;  %s1011_s15 = sphi %s1054_s15, %s1782_s15   ;;  %s1007_s14 = sphi %s1052_s14, %s1781_s14   ;;  %s1003_s13 = sphi %s1050_s13, %s1780_s13   ;;  %s999_s12 = sphi %s1048_s12, %s1779_s12  }
   0x7   : > { %s31_s20 = sadd.s32 1, %s1015_s16  ;;  %s40_s21 = sadd.s32 1, %s1007_s14 }
   0x8   : > { %p33_p0 = scmp.ge.s32.totalorder %s31_s20, 2  ;;  %p47_p1 = scmp.ne.s32.totalorder %s1007_s14, %s1003_s13 }
   0x9   : > { %p48_p2 = scmp.eq.s32.totalorder %s1019_s17, 0  ;;  %p53_p3 = scmp.ne.s32.totalorder %s1003_s13, %s999_s12 }
   0xa   : > { %s1785_s20 = smov (%p33_p0, %s31_s20), 0  ;;  %p54_p5 = scmp.eq.s32.totalorder %s821_s18, 0 }
   0xb   : > { %p1089_p4 = por %p48_p2, %p47_p1  ;;  %s35_s23 = ssub.s32 %s1015_s16, %s1785_s20 }
   0xc   : > { %p121_p6 = scmp.eq.s32.totalorder %s821_s18, 1  ;;  %p38_p7 = scmp.eq.s32.totalorder %s35_s23, 0 }
   0xd   : > { %p1095_p8 = por %p54_p5, %p53_p3  ;;  %p127_p10 = scmp.eq.s32.totalorder %s822_s19, 1 }
   0xe   : > { %p1099_p9 = por %p121_p6, %p47_p1  ;;  %p850_p13 = scmp.lt.s32.totalorder %s1019_s17, 2 }
   0xf   : > { %s1104_s26 = scalar_select %p38_p7, %s1007_s14, %s40_s21  }
  0x10   : > { %p1106_p11 = por %p127_p10, %p53_p3  ;;  %s153_s28 = sand.u32 1, %s1007_s14  }
  0x11   : > { %s825_s29 = sshll.u32 %s153_s28, 8  ;;  %s836_s30 = sshll.u32 %s1015_s16, 12 }
  0x12   : > { %s165_s6 = scalar_lea.hbm %s1763_s0, %s836_s30  ;;  %s157_s7 = scalar_lea.vmem [#allocation2], %s825_s29 }
  0x13   : > { %s166_s8 = sshll.u32 %s157_s7, 4  ;;  %p1119_p0 = pnand %p850_p13, %p1089_p4  ;;  %s167_s8 = int_to_ptr.vmem [resolvable:$true] %s166_s8 }
  0x14   : > { %p828_p1 = scmp.ge.s32.totalorder %s1019_s17, 1  ;;  %s154_s10 = scalar_lea.sflag [#allocation3], %s153_s28 }
  0x15   : > { %p913_p2 = pneg %p1119_p0  ;;  %s924_s11 = scalar_lea.vmem %s167_s8, 4096 }
  0x16   : > { %p925_p3 = scmp.ne.s32.totalorder %s167_s8, %s924_s11  ;;  %s1021_s18 = smov [#allocation2]  }
  0x17   : > { %s929_s19 = sshll.u32 %s1021_s18, 4  ;;  %s930_s19 = int_to_ptr.vmem [resolvable:$false] %s929_s19 }
  0x18   : > { %p927_p5 = pnand %p925_p3, %p913_p2  ;;  %s931_s21 = scalar_lea.vmem %s930_s19, 8192 }
  0x19   : > { %p932_p7 = scmp.lt.s32.totalorder %s167_s8, %s930_s19  ;;  %p933_p10 = scmp.lt.s32.totalorder %s931_s21, %s924_s11 }
  0x1a   : > { %p928_p6 = pneg %p927_p5 }
  0x1b   : > { %p934_p12 = por %p933_p10, %p932_p7 }
  0x1d   : > { %p935_p4 = pnand %p934_p12, %p928_p6 }
  0x1f   : > { %938 = shalt.err (!%p935_p4)
}
  0x20   : > { %s1022_s22 = smov 256   ;;  %s1023_s23 = smov 16  }
  0x21   : > { %845 = dma.hbm_to_vmem [thread:$0]  (!%p1119_p0), %s165_s6, 4096, %s167_s8, %s154_s10, %s1022_s22, %s1022_s22, %s1023_s23  }
  0x22   : > { %p174_p13 = scmp.lt.s32.totalorder %s1019_s17, 3 }
  0x24   : > { %p175_p2 = pnand %p828_p1, %p174_p13 }
  0x26   : > { %178 = sbr.rel (%p175_p2) target bundleno = 250 (0xfa), region = 32 }
  0x2b   : > { %s1132_s28 = sand.u32 1, %s1003_s13  }
  0x2c   : > { %s829_s29 = sshll.u32 %s1132_s28, 8  ;;  %s181_s30 = scalar_lea.sflag [#allocation3], %s1132_s28 }
  0x2d   : > { %s1138_s4 = scalar_lea.vmem [#allocation2], %s829_s29 }
  0x2e   : > { %990 = dma.done.wait (%p1095_p8), %s181_s30, 4096  }
  0x2f   : > { %992 = vsyncadd (%p1095_p8), %s181_s30, 4294963200  ;;  %v1024_v0 = vmov 0   ;;  %v432_v1 = vld [vmem:[%s1764_s1 + $0x10] sm:$0xff]  ;;  %v430_v2 = vld [vmem:[%s1764_s1] sm:$0xff]  ;;  %s1614_s10 = scalar_lea.vmem [#allocation5], %s829_s29  ;;  %s837_s29 = sshll.u32 %s1011_s15, 12 }
  0x30   : > { %906 = vset.pattern.permute.xlu1 %v1024_v0  ;;  %905 = vset.pattern.permute.xlu0 %v1024_v0  ;;  %v433_v3 = vld [vmem:[%s1764_s1 + $0x18] sm:$0xff]  ;;  %v431_v4 = vld [vmem:[%s1764_s1 + $0x8] sm:$0xff]  ;;  %v434_v6 = vld [vmem:[%s1764_s1 + $0x20] sm:$0xff]  ;;  %s734_s11 = sshll.u32 %s1614_s10, 4  ;;  %s1709_s19 = scalar_lea.hbm %s1766_s3, %s837_s29  ;;  %s1711_s11 = int_to_ptr.vmem [resolvable:$true] %s734_s11 }
  0x31   : > { %458 = vperm.xlu1 %906, %v432_v1   ;;  %448 = vperm.xlu0 %905, %v430_v2   ;;  %v435_v5 = vld [vmem:[%s1764_s1 + $0x28] sm:$0xff]  ;;  %v437_v7 = vld [vmem:[%s1764_s1 + $0x38] sm:$0xff]  ;;  %v436_v8 = vld [vmem:[%s1764_s1 + $0x30] sm:$0xff]  ;;  %s719_s21 = scalar_lea.sflag [#allocation4], %s1132_s28  ;;  %s939_s22 = scalar_lea.vmem %s1711_s11, 4096 }
  0x32   : > { %v1169_v9 = vld [vmem:[%s1138_s4] sm:$0xff]  ;;  %v1172_v10 = vld [vmem:[%s1138_s4 + $0x8] sm:$0xff]  ;;  %v1175_v11 = vld [vmem:[%s1138_s4 + $0x10] sm:$0xff]  ;;  %p940_p8 = scmp.ne.s32.totalorder %s1711_s11, %s939_s22  ;;  %s1025_s23 = smov [#allocation5]  }
  0x33   : > { %v1178_v12 = vld [vmem:[%s1138_s4 + $0x18] sm:$0xff]  ;;  %v1181_v13 = vld [vmem:[%s1138_s4 + $0x20] sm:$0xff]  ;;  %v1184_v14 = vld [vmem:[%s1138_s4 + $0x28] sm:$0xff]  ;;  %v241_v15 = vadd.f32 %v1175_v11, %v1169_v9  ;;  %s943_s30 = sshll.u32 %s1025_s23, 4  ;;  %s944_s30 = int_to_ptr.vmem [resolvable:$false] %s943_s30 }
  0x34   : > { %v262_v16 = vadd.f32 %v1178_v12, %v1172_v10  ;;  %v1191_v17 = vld [vmem:[%s1138_s4 + $0x30] sm:$0xff]  ;;  %v1194_v18 = vld [vmem:[%s1138_s4 + $0x38] sm:$0xff]  ;;  %v439_v19 = vld [vmem:[%s1764_s1 + $0x48] sm:$0xff]  ;;  %p941_p12 = pnand %p940_p8, %p1099_p9  ;;  %s945_s5 = scalar_lea.vmem %s944_s30, 8192 }
  0x35   : > { %463 = vperm.xlu1 %906, %v433_v3   ;;  %453 = vperm.xlu0 %905, %v431_v4   ;;  %v438_v20 = vld [vmem:[%s1764_s1 + $0x40] sm:$0xff]  ;;  %v242_v21 = vadd.f32 %v241_v15, %v1181_v13  ;;  %v1208_v24 = vld [vmem:[%s1138_s4 + $0x48] sm:$0xff]  ;;  %v1213_v27 = vld [vmem:[%s1138_s4 + $0x50] sm:$0xff]  ;;  %p946_p1 = scmp.lt.s32.totalorder %s1711_s11, %s944_s30  ;;  %p947_p3 = scmp.lt.s32.totalorder %s945_s5, %s939_s22 }
  0x36   : > { %v263_v22 = vadd.f32 %v262_v16, %v1184_v14  ;;  %v1205_v23 = vld [vmem:[%s1138_s4 + $0x40] sm:$0xff]  ;;  %v1216_v28 = vld [vmem:[%s1138_s4 + $0x58] sm:$0xff]  ;;  %v440_v30 = vld [vmem:[%s1764_s1 + $0x50] sm:$0xff]  ;;  %p942_p0 = pneg %p941_p12 }
  0x37   : > { %v243_v25 = vadd.f32 %v242_v21, %v1191_v17  ;;  %v441_v29 = vld [vmem:[%s1764_s1 + $0x58] sm:$0xff]  ;;  %v1227_v33 = vld [vmem:[%s1138_s4 + $0x60] sm:$0xff]  ;;  %v1230_v34 = vld [vmem:[%s1138_s4 + $0x68] sm:$0xff]  ;;  %p948_p5 = por %p947_p3, %p946_p1 }
  0x38   : > { %v264_v26 = vadd.f32 %v263_v22, %v1194_v18  ;;  %v1235_v37 = vld [vmem:[%s1138_s4 + $0x70] sm:$0xff]  ;;  %v1238_v38 = vld [vmem:[%s1138_s4 + $0x78] sm:$0xff]  ;;  %v443_v39 = vld [vmem:[%s1764_s1 + $0x68] sm:$0xff] }
  0x39   : > { %473 = vperm.xlu1 %906, %v435_v5   ;;  %468 = vperm.xlu0 %905, %v434_v6   ;;  %v244_v31 = vadd.f32 %v243_v25, %v1205_v23  ;;  %v442_v40 = vld [vmem:[%s1764_s1 + $0x60] sm:$0xff]  ;;  %v1252_v44 = vld [vmem:[%s1138_s4 + $0x88] sm:$0xff]  ;;  %v1257_v47 = vld [vmem:[%s1138_s4 + $0x90] sm:$0xff]  ;;  %p949_p6 = pnand %p948_p5, %p942_p0 }
  0x3a   : > { %v265_v32 = vadd.f32 %v264_v26, %v1208_v24  ;;  %v1249_v43 = vld [vmem:[%s1138_s4 + $0x80] sm:$0xff]  ;;  %v1260_v48 = vld [vmem:[%s1138_s4 + $0x98] sm:$0xff]  ;;  %v444_v50 = vld [vmem:[%s1764_s1 + $0x70] sm:$0xff] }
  0x3b   : > { %v245_v35 = vadd.f32 %v244_v31, %v1213_v27  ;;  %v445_v49 = vld [vmem:[%s1764_s1 + $0x78] sm:$0xff]  ;;  %v1271_v53 = vld [vmem:[%s1138_s4 + $0xa0] sm:$0xff]  ;;  %v1274_v54 = vld [vmem:[%s1138_s4 + $0xa8] sm:$0xff] }
  0x3c   : > { %v266_v36 = vadd.f32 %v265_v32, %v1216_v28  ;;  %v1279_v57 = vld [vmem:[%s1138_s4 + $0xb0] sm:$0xff]  ;;  %v1282_v58 = vld [vmem:[%s1138_s4 + $0xb8] sm:$0xff]  ;;  %v559_v59 = vld [vmem:[%s1765_s2 + $0x8] sm:$0xff] }
  0x3d   : > { %483 = vperm.xlu1 %906, %v437_v7   ;;  %478 = vperm.xlu0 %905, %v436_v8   ;;  %v246_v41 = vadd.f32 %v245_v35, %v1227_v33  ;;  %v558_v60 = vld [vmem:[%s1765_s2] sm:$0xff]  ;;  %v1296_v0 = vld [vmem:[%s1138_s4 + $0xc8] sm:$0xff]  ;;  %v1301_v3 = vld [vmem:[%s1138_s4 + $0xd0] sm:$0xff] }
  0x3e   : > { %v267_v42 = vadd.f32 %v266_v36, %v1230_v34  ;;  %v1293_v63 = vld [vmem:[%s1138_s4 + $0xc0] sm:$0xff]  ;;  %v1304_v4 = vld [vmem:[%s1138_s4 + $0xd8] sm:$0xff]  ;;  %v560_v6 = vld [vmem:[%s1765_s2 + $0x10] sm:$0xff] }
  0x3f   : > { %v247_v45 = vadd.f32 %v246_v41, %v1235_v37  ;;  %v561_v5 = vld [vmem:[%s1765_s2 + $0x18] sm:$0xff]  ;;  %v1315_v15 = vld [vmem:[%s1138_s4 + $0xe0] sm:$0xff]  ;;  %v1318_v16 = vld [vmem:[%s1138_s4 + $0xe8] sm:$0xff] }
  0x40   : > { %v268_v46 = vadd.f32 %v267_v42, %v1238_v38  ;;  %v1323_v21 = vld [vmem:[%s1138_s4 + $0xf0] sm:$0xff]  ;;  %v1326_v22 = vld [vmem:[%s1138_s4 + $0xf8] sm:$0xff]  ;;  %v563_v25 = vld [vmem:[%s1765_s2 + $0x28] sm:$0xff] }
  0x41   : > { %493 = vperm.xlu1 %906, %v439_v19   ;;  %488 = vperm.xlu0 %905, %v438_v20   ;;  %v248_v51 = vadd.f32 %v247_v45, %v1249_v43  ;;  %v562_v26 = vld [vmem:[%s1765_s2 + $0x20] sm:$0xff]  ;;  %v565_v35 = vld [vmem:[%s1765_s2 + $0x38] sm:$0xff]  ;;  %v564_v36 = vld [vmem:[%s1765_s2 + $0x30] sm:$0xff] }
  0x42   : > { %v269_v52 = vadd.f32 %v268_v46, %v1252_v44  ;;  %v567_v45 = vld [vmem:[%s1765_s2 + $0x48] sm:$0xff]  ;;  %v566_v46 = vld [vmem:[%s1765_s2 + $0x40] sm:$0xff] }
  0x43   : > { %v249_v55 = vadd.f32 %v248_v51, %v1257_v47 }
  0x44   : > { %v270_v56 = vadd.f32 %v269_v52, %v1260_v48 }
  0x45   : > { %503 = vperm.xlu1 %906, %v441_v29   ;;  %498 = vperm.xlu0 %905, %v440_v30   ;;  %v250_v61 = vadd.f32 %v249_v55, %v1271_v53  ;;  %v569_v55 = vld [vmem:[%s1765_s2 + $0x58] sm:$0xff] }
  0x46   : > { %v271_v62 = vadd.f32 %v270_v56, %v1274_v54  ;;  %v568_v56 = vld [vmem:[%s1765_s2 + $0x50] sm:$0xff] }
  0x47   : > { %v251_v1 = vadd.f32 %v250_v61, %v1279_v57  ;;  %v571_v61 = vld [vmem:[%s1765_s2 + $0x68] sm:$0xff] }
  0x48   : > { %v272_v2 = vadd.f32 %v271_v62, %v1282_v58  ;;  %v570_v62 = vld [vmem:[%s1765_s2 + $0x60] sm:$0xff] }
  0x49   : > { %513 = vperm.xlu1 %906, %v443_v39   ;;  %508 = vperm.xlu0 %905, %v442_v40   ;;  %v252_v7 = vadd.f32 %v251_v1, %v1293_v63 }
  0x4a   : > { %v273_v8 = vadd.f32 %v272_v2, %v1296_v0 }
  0x4b   : > { %v253_v19 = vadd.f32 %v252_v7, %v1301_v3 }
  0x4c   : > { %v274_v20 = vadd.f32 %v273_v8, %v1304_v4 }
  0x4d   : > { %523 = vperm.xlu1 %906, %v445_v49   ;;  %518 = vperm.xlu0 %905, %v444_v50   ;;  %v254_v29 = vadd.f32 %v253_v19, %v1315_v15 }
  0x4e   : > { %v275_v30 = vadd.f32 %v274_v20, %v1318_v16 }
  0x4f   : > { %v255_v31 = vadd.f32 %v254_v29, %v1323_v21 }
  0x50   : > { %v276_v32 = vadd.f32 %v275_v30, %v1326_v22 }
  0x51   : > { %581 = vperm.xlu1 %906, %v559_v59   ;;  %576 = vperm.xlu0 %905, %v558_v60   ;;  %v256_v39 = vrot.slane %v255_v31, 4 }
  0x52   : > { %v277_v40 = vrot.slane %v276_v32, 4 }
  0x53   : > { %v257_v41 = vadd.f32 %v256_v39, %v255_v31 }
  0x54   : > { %v278_v42 = vadd.f32 %v277_v40, %v276_v32 }
  0x55   : > { %591 = vperm.xlu1 %906, %v561_v5   ;;  %586 = vperm.xlu0 %905, %v560_v6   ;;  %v258_v49 = vrot.slane %v257_v41, 2  ;;  %v573_v5 = vld [vmem:[%s1765_s2 + $0x78] sm:$0xff]  ;;  %v572_v6 = vld [vmem:[%s1765_s2 + $0x70] sm:$0xff] }
  0x56   : > { %v279_v50 = vrot.slane %v278_v42, 2 }
  0x57   : > { %v259_v51 = vadd.f32 %v258_v49, %v257_v41 }
  0x58   : > { %v280_v52 = vadd.f32 %v279_v50, %v278_v42 }
  0x59   : > { %601 = vperm.xlu1 %906, %v563_v25   ;;  %596 = vperm.xlu0 %905, %v562_v26   ;;  %v260_v59 = vrot.slane %v259_v51, 1 }
  0x5a   : > { %v281_v60 = vrot.slane %v280_v52, 1 }
  0x5b   : > { %v261_v1 = vadd.f32 %v260_v59, %v259_v51 }
  0x5c   : > { %v282_v2 = vadd.f32 %v281_v60, %v280_v52 }
  0x5d   : > { %611 = vperm.xlu1 %906, %v565_v35   ;;  %606 = vperm.xlu0 %905, %v564_v36   ;;  %v1368_v7 = vmul.f32 0.0078125, %v261_v1 }
  0x5e   : > { %v1370_v8 = vmul.f32 0.0078125, %v282_v2 }
  0x5f   : > { %v1374_v19 = vsub.f32 %v1169_v9, %v1368_v7  ;;  %v1382_v25 = vsub.f32 %v1175_v11, %v1368_v7  ;;  %v1390_v29 = vsub.f32 %v1181_v13, %v1368_v7  ;;  %v1426_v35 = vsub.f32 %v1213_v27, %v1368_v7 }
  0x60   : > { %v1378_v20 = vsub.f32 %v1172_v10, %v1370_v8  ;;  %v1386_v26 = vsub.f32 %v1178_v12, %v1370_v8  ;;  %v1394_v9 = vsub.f32 %v1184_v14, %v1370_v8  ;;  %v1398_v10 = vsub.f32 %v1191_v17, %v1368_v7 }
  0x61   : > { %621 = vperm.xlu1 %906, %v567_v45   ;;  %616 = vperm.xlu0 %905, %v566_v46   ;;  %v1402_v11 = vsub.f32 %v1194_v18, %v1370_v8  ;;  %v318_v12 = vmul.f32 %v1374_v19, %v1374_v19  ;;  %v320_v13 = vmul.f32 %v1382_v25, %v1382_v25 }
  0x62   : > { %v319_v30 = vmul.f32 %v1378_v20, %v1378_v20  ;;  %v321_v14 = vmul.f32 %v1386_v26, %v1386_v26  ;;  %v1414_v17 = vsub.f32 %v1205_v23, %v1368_v7  ;;  %v1418_v18 = vsub.f32 %v1208_v24, %v1370_v8 }
  0x63   : > { %v322_v31 = vmul.f32 %v1390_v29, %v1390_v29  ;;  %v323_v32 = vmul.f32 %v1394_v9, %v1394_v9  ;;  %v1430_v36 = vsub.f32 %v1216_v28, %v1370_v8  ;;  %v324_v23 = vmul.f32 %v1398_v10, %v1398_v10 }
  0x64   : > { %v325_v24 = vmul.f32 %v1402_v11, %v1402_v11  ;;  %v350_v39 = vadd.f32 %v320_v13, %v318_v12  ;;  %v371_v40 = vadd.f32 %v321_v14, %v319_v30  ;;  %v1438_v41 = vsub.f32 %v1227_v33, %v1368_v7 }
  0x65   : > { %631 = vperm.xlu1 %906, %v569_v55   ;;  %626 = vperm.xlu0 %905, %v568_v56   ;;  %v1442_v27 = vsub.f32 %v1230_v34, %v1370_v8  ;;  %v326_v28 = vmul.f32 %v1414_v17, %v1414_v17  ;;  %v327_v42 = vmul.f32 %v1418_v18, %v1418_v18 }
  0x66   : > { %v351_v45 = vadd.f32 %v350_v39, %v322_v31  ;;  %v372_v46 = vadd.f32 %v371_v40, %v323_v32  ;;  %v1450_v49 = vsub.f32 %v1235_v37, %v1368_v7  ;;  %v1454_v33 = vsub.f32 %v1238_v38, %v1370_v8 }
  0x67   : > { %v328_v34 = vmul.f32 %v1426_v35, %v1426_v35  ;;  %v329_v50 = vmul.f32 %v1430_v36, %v1430_v36  ;;  %v1462_v55 = vsub.f32 %v1249_v43, %v1368_v7  ;;  %v1466_v37 = vsub.f32 %v1252_v44, %v1370_v8 }
  0x68   : > { %v352_v51 = vadd.f32 %v351_v45, %v324_v23  ;;  %v373_v52 = vadd.f32 %v372_v46, %v325_v24  ;;  %v330_v38 = vmul.f32 %v1438_v41, %v1438_v41  ;;  %v331_v56 = vmul.f32 %v1442_v27, %v1442_v27 }
  0x69   : > { %641 = vperm.xlu1 %906, %v571_v61   ;;  %636 = vperm.xlu0 %905, %v570_v62   ;;  %v1474_v61 = vsub.f32 %v1257_v47, %v1368_v7  ;;  %v1478_v43 = vsub.f32 %v1260_v48, %v1370_v8  ;;  %v332_v44 = vmul.f32 %v1450_v49, %v1450_v49 }
  0x6a   : > { %v353_v59 = vadd.f32 %v352_v51, %v326_v28  ;;  %v374_v60 = vadd.f32 %v373_v52, %v327_v42  ;;  %v333_v62 = vmul.f32 %v1454_v33, %v1454_v33  ;;  %v1490_v47 = vsub.f32 %v1274_v54, %v1370_v8 }
  0x6b   : > { %v334_v48 = vmul.f32 %v1462_v55, %v1462_v55  ;;  %v1498_v13 = vsub.f32 %v1279_v57, %v1368_v7  ;;  %v336_v54 = vmul.f32 %v1474_v61, %v1474_v61  ;;  %v337_v14 = vmul.f32 %v1478_v43, %v1478_v43 }
  0x6c   : > { %v354_v1 = vadd.f32 %v353_v59, %v328_v34  ;;  %v375_v2 = vadd.f32 %v374_v60, %v329_v50  ;;  %v1510_v23 = vsub.f32 %v1293_v63, %v1368_v7  ;;  %v1514_v57 = vsub.f32 %v1296_v0, %v1370_v8 }
  0x6d   : > { %651 = vperm.xlu1 %906, %v573_v5   ;;  %646 = vperm.xlu0 %905, %v572_v6   ;;  %v1486_v5 = vsub.f32 %v1271_v53, %v1368_v7  ;;  %v335_v6 = vmul.f32 %v1466_v37, %v1466_v37  ;;  %v1502_v53 = vsub.f32 %v1282_v58, %v1370_v8 }
  0x6e   : > { %v355_v12 = vadd.f32 %v354_v1, %v330_v38  ;;  %v376_v30 = vadd.f32 %v375_v2, %v331_v56  ;;  %v339_v24 = vmul.f32 %v1490_v47, %v1490_v47  ;;  %v1522_v28 = vsub.f32 %v1301_v3, %v1368_v7 }
  0x6f   : > { %v338_v58 = vmul.f32 %v1486_v5, %v1486_v5  ;;  %v1526_v63 = vsub.f32 %v1304_v4, %v1370_v8  ;;  %v340_v0 = vmul.f32 %v1498_v13, %v1498_v13  ;;  %v341_v42 = vmul.f32 %v1502_v53, %v1502_v53 }
  0x70   : > { %v356_v31 = vadd.f32 %v355_v12, %v332_v44  ;;  %v377_v32 = vadd.f32 %v376_v30, %v333_v62  ;;  %v1534_v34 = vsub.f32 %v1315_v15, %v1368_v7  ;;  %v1538_v3 = vsub.f32 %v1318_v16, %v1370_v8 }
  0x71   : > { %v342_v4 = vmul.f32 %v1510_v23, %v1510_v23  ;;  %v343_v50 = vmul.f32 %v1514_v57, %v1514_v57  ;;  %v1546_v38 = vsub.f32 %v1323_v21, %v1368_v7  ;;  %v1550_v15 = vsub.f32 %v1326_v22, %v1370_v8 }
  0x72   : > { %v357_v39 = vadd.f32 %v356_v31, %v334_v48  ;;  %v378_v40 = vadd.f32 %v377_v32, %v335_v6  ;;  %v344_v16 = vmul.f32 %v1522_v28, %v1522_v28  ;;  %v345_v56 = vmul.f32 %v1526_v63, %v1526_v63 }
  0x73   : > { %v346_v44 = vmul.f32 %v1534_v34, %v1534_v34  ;;  %v347_v62 = vmul.f32 %v1538_v3, %v1538_v3  ;;  %v348_v22 = vmul.f32 %v1546_v38, %v1546_v38  ;;  %v349_v8 = vmul.f32 %v1550_v15, %v1550_v15 }
  0x74   : > { %v358_v45 = vadd.f32 %v357_v39, %v336_v54  ;;  %v379_v46 = vadd.f32 %v378_v40, %v337_v14 }
  0x76   : > { %v359_v51 = vadd.f32 %v358_v45, %v338_v58  ;;  %v380_v52 = vadd.f32 %v379_v46, %v339_v24 }
  0x78   : > { %v360_v59 = vadd.f32 %v359_v51, %v340_v0  ;;  %v381_v60 = vadd.f32 %v380_v52, %v341_v42 }
  0x7a   : > { %v361_v21 = vadd.f32 %v360_v59, %v342_v4  ;;  %v382_v7 = vadd.f32 %v381_v60, %v343_v50 }
  0x7c   : > { %v362_v1 = vadd.f32 %v361_v21, %v344_v16  ;;  %v383_v2 = vadd.f32 %v382_v7, %v345_v56 }
  0x7e   : > { %v363_v48 = vadd.f32 %v362_v1, %v346_v44  ;;  %v384_v6 = vadd.f32 %v383_v2, %v347_v62 }
  0x80   : > { %v364_v12 = vadd.f32 %v363_v48, %v348_v22  ;;  %v385_v30 = vadd.f32 %v384_v6, %v349_v8 }
  0x82   : > { %v365_v54 = vrot.slane %v364_v12, 4  ;;  %v386_v14 = vrot.slane %v385_v30, 4 }
  0x84   : > { %v366_v31 = vadd.f32 %v365_v54, %v364_v12  ;;  %v387_v32 = vadd.f32 %v386_v14, %v385_v30 }
  0x86   : > { %v367_v58 = vrot.slane %v366_v31, 2  ;;  %v388_v24 = vrot.slane %v387_v32, 2 }
  0x88   : > { %v368_v39 = vadd.f32 %v367_v58, %v366_v31  ;;  %v389_v40 = vadd.f32 %v388_v24, %v387_v32 }
  0x8a   : > { %v369_v0 = vrot.slane %v368_v39, 1  ;;  %v390_v42 = vrot.slane %v389_v40, 1 }
  0x8c   : > { %v370_v45 = vadd.f32 %v369_v0, %v368_v39  ;;  %v391_v46 = vadd.f32 %v390_v42, %v389_v40 }
  0x8e   : > { %v392_v51 = vmul.f32 0.0078125, %v370_v45  ;;  %v393_v52 = vmul.f32 0.0078125, %v391_v46 }
  0x90   : > { %v394_v59 = vadd.f32 1e-06, %v392_v51  ;;  %v395_v60 = vadd.f32 1e-06, %v393_v52 }
  0x92   : > { %907 = vrsqrt.f32 %v394_v59 }
  0x93   : > { %909 = vrsqrt.f32 %v395_v60 }
  0x9f   : > { %v1576_v48 = vpop.eup %907 }
  0xa0   : > { %v1578_v6 = vpop.eup %909  ;;  %v398_v54 = vmul.f32 %v1576_v48, %v1374_v19  ;;  %v400_v31 = vmul.f32 %v1576_v48, %v1382_v25  ;;  %v402_v39 = vmul.f32 %v1576_v48, %v1390_v29  ;;  %v404_v19 = vmul.f32 %v1576_v48, %v1398_v10 }
  0xa1   : > { %v399_v14 = vmul.f32 %v1578_v6, %v1378_v20  ;;  %v401_v32 = vmul.f32 %v1578_v6, %v1386_v26  ;;  %v403_v40 = vmul.f32 %v1578_v6, %v1394_v9  ;;  %v405_v20 = vmul.f32 %v1578_v6, %v1402_v11 }
  0xa2   : > { %v408_v10 = vmul.f32 %v1576_v48, %v1426_v35  ;;  %v409_v11 = vmul.f32 %v1578_v6, %v1430_v36 }
  0xac   : > { %v459_v4 = vpop.permute.xlu1 %458  ;;  %v449_v50 = vpop.permute.xlu0 %448 }
  0xad   : > { %v526_v25 = vmul.f32 %v449_v50, %v398_v54  ;;  %v527_v0 = vmul.f32 %v449_v50, %v399_v14  ;;  %v530_v60 = vmul.f32 %v459_v4, %v402_v39  ;;  %v406_v50 = vmul.f32 %v1576_v48, %v1414_v17 }
  0xae   : > { %v412_v54 = vmul.f32 %v1576_v48, %v1450_v49  ;;  %v413_v14 = vmul.f32 %v1578_v6, %v1454_v33 }
  0xb0   : > { %v464_v16 = vpop.permute.xlu1 %463  ;;  %v454_v56 = vpop.permute.xlu0 %453 }
  0xb1   : > { %v528_v42 = vmul.f32 %v454_v56, %v400_v31  ;;  %v529_v26 = vmul.f32 %v454_v56, %v401_v32  ;;  %v532_v9 = vmul.f32 %v464_v16, %v404_v19  ;;  %v407_v56 = vmul.f32 %v1578_v6, %v1418_v18 }
  0xb2   : > { %v410_v31 = vmul.f32 %v1576_v48, %v1438_v41  ;;  %v411_v32 = vmul.f32 %v1578_v6, %v1442_v27 }
  0xb4   : > { %v474_v44 = vpop.permute.xlu1 %473  ;;  %v469_v62 = vpop.permute.xlu0 %468 }
  0xb5   : > { %v536_v39 = vmul.f32 %v474_v44, %v408_v10  ;;  %v534_v19 = vmul.f32 %v469_v62, %v406_v50 }
  0xb8   : > { %v1564_v21 = vpop.permute.xlu1 %483  ;;  %v1566_v7 = vpop.permute.xlu0 %478 }
  0xb9   : > { %v540_v27 = vmul.f32 %v1564_v21, %v412_v54 }
  0xbc   : > { %v1568_v22 = vpop.permute.xlu1 %493  ;;  %v1570_v8 = vpop.permute.xlu0 %488 }
  0xc0   : > { %v1572_v1 = vpop.permute.xlu1 %503  ;;  %v1574_v2 = vpop.permute.xlu0 %498 }
  0xc4   : > { %v1580_v12 = vpop.permute.xlu1 %513  ;;  %v1582_v30 = vpop.permute.xlu0 %508 }
  0xc8   : > { %v1592_v58 = vpop.permute.xlu1 %523  ;;  %v1594_v24 = vpop.permute.xlu0 %518 }
  0xc9   : > { %1774 = vst [vmem:[#allocation8_spill] sm:$0xff] %v1592_v58  ;;  %1775 = vst [vmem:[#allocation9_spill] sm:$0xff] %v1594_v24  ;;  %v531_v24 = vmul.f32 %v459_v4, %v403_v40  ;;  %v533_v58 = vmul.f32 %v464_v16, %v405_v20  ;;  %v537_v40 = vmul.f32 %v474_v44, %v409_v11 }
  0xca   : > { %v535_v20 = vmul.f32 %v469_v62, %v407_v56  ;;  %v541_v44 = vmul.f32 %v1564_v21, %v413_v14  ;;  %v538_v62 = vmul.f32 %v1566_v7, %v410_v31  ;;  %v426_v31 = vmul.f32 %v1576_v48, %v1534_v34 }
  0xcc   : > { %v582_v45 = vpop.permute.xlu1 %581  ;;  %v577_v46 = vpop.permute.xlu0 %576 }
  0xcd   : > { %v656_v51 = vadd.f32 %v582_v45, %v528_v42  ;;  %v657_v52 = vadd.f32 %v582_v45, %v529_v26  ;;  %v654_v59 = vadd.f32 %v577_v46, %v526_v25  ;;  %v655_v29 = vadd.f32 %v577_v46, %v527_v0 }
  0xce   : > { %v539_v0 = vmul.f32 %v1566_v7, %v411_v32  ;;  %v416_v42 = vmul.f32 %v1576_v48, %v1474_v61  ;;  %v417_v26 = vmul.f32 %v1578_v6, %v1478_v43  ;;  %v414_v45 = vmul.f32 %v1576_v48, %v1462_v55 }
  0xcf   : > { %688 = vst [vmem:[%s1614_s10 + $0x10] sm:$0xff] %v656_v51  ;;  %689 = vst [vmem:[%s1614_s10 + $0x18] sm:$0xff] %v657_v52  ;;  %v415_v46 = vmul.f32 %v1578_v6, %v1466_v37  ;;  %v420_v55 = vmul.f32 %v1576_v48, %v1498_v13  ;;  %v421_v37 = vmul.f32 %v1578_v6, %v1502_v53 }
  0xd0   : > { %686 = vst [vmem:[%s1614_s10] sm:$0xff] %v654_v59  ;;  %687 = vst [vmem:[%s1614_s10 + $0x8] sm:$0xff] %v655_v29  ;;  %v592_v35 = vpop.permute.xlu1 %591  ;;  %v587_v36 = vpop.permute.xlu0 %586  ;;  %v418_v59 = vmul.f32 %v1576_v48, %v1486_v5  ;;  %v419_v29 = vmul.f32 %v1578_v6, %v1490_v47  ;;  %v542_v10 = vmul.f32 %v1570_v8, %v414_v45 }
  0xd1   : > { %v660_v17 = vadd.f32 %v592_v35, %v532_v9  ;;  %v661_v4 = vadd.f32 %v592_v35, %v533_v58  ;;  %v658_v18 = vadd.f32 %v587_v36, %v530_v60  ;;  %v659_v16 = vadd.f32 %v587_v36, %v531_v24 }
  0xd2   : > { %v544_v60 = vmul.f32 %v1568_v22, %v416_v42  ;;  %v545_v9 = vmul.f32 %v1568_v22, %v417_v26  ;;  %v543_v11 = vmul.f32 %v1570_v8, %v415_v46  ;;  %v424_v22 = vmul.f32 %v1576_v48, %v1522_v28 }
  0xd3   : > { %692 = vst [vmem:[%s1614_s10 + $0x30] sm:$0xff] %v660_v17  ;;  %693 = vst [vmem:[%s1614_s10 + $0x38] sm:$0xff] %v661_v4  ;;  %v425_v8 = vmul.f32 %v1578_v6, %v1526_v63  ;;  %v422_v35 = vmul.f32 %v1576_v48, %v1510_v23  ;;  %v423_v36 = vmul.f32 %v1578_v6, %v1514_v57 }
  0xd4   : > { %690 = vst [vmem:[%s1614_s10 + $0x20] sm:$0xff] %v658_v18  ;;  %691 = vst [vmem:[%s1614_s10 + $0x28] sm:$0xff] %v659_v16  ;;  %v602_v49 = vpop.permute.xlu1 %601  ;;  %v597_v58 = vpop.permute.xlu0 %596  ;;  %v548_v17 = vmul.f32 %v1572_v1, %v420_v55  ;;  %v549_v4 = vmul.f32 %v1572_v1, %v421_v37  ;;  %v546_v18 = vmul.f32 %v1574_v2, %v418_v59 }
  0xd5   : > { %v664_v33 = vadd.f32 %v602_v49, %v536_v39  ;;  %v665_v24 = vadd.f32 %v602_v49, %v537_v40  ;;  %v662_v41 = vadd.f32 %v597_v58, %v534_v19  ;;  %v663_v25 = vadd.f32 %v597_v58, %v535_v20  ;;  %v1777_v58 = vld [vmem:[#allocation9_spill] sm:$0xff] }
  0xd6   : > { %v547_v16 = vmul.f32 %v1574_v2, %v419_v29  ;;  %v428_v1 = vmul.f32 %v1576_v48, %v1546_v38  ;;  %v429_v2 = vmul.f32 %v1578_v6, %v1550_v15  ;;  %v427_v32 = vmul.f32 %v1578_v6, %v1538_v3 }
  0xd7   : > { %696 = vst [vmem:[%s1614_s10 + $0x50] sm:$0xff] %v664_v33  ;;  %697 = vst [vmem:[%s1614_s10 + $0x58] sm:$0xff] %v665_v24  ;;  %v552_v39 = vmul.f32 %v1580_v12, %v424_v22  ;;  %v553_v40 = vmul.f32 %v1580_v12, %v425_v8  ;;  %v550_v19 = vmul.f32 %v1582_v30, %v422_v35  ;;  %v1776_v12 = vld [vmem:[#allocation8_spill] sm:$0xff] }
  0xd8   : > { %694 = vst [vmem:[%s1614_s10 + $0x40] sm:$0xff] %v662_v41  ;;  %695 = vst [vmem:[%s1614_s10 + $0x48] sm:$0xff] %v663_v25  ;;  %v612_v21 = vpop.permute.xlu1 %611  ;;  %v607_v7 = vpop.permute.xlu0 %606  ;;  %v551_v20 = vmul.f32 %v1582_v30, %v423_v36  ;;  %v556_v49 = vmul.f32 %v1776_v12, %v428_v1  ;;  %v557_v30 = vmul.f32 %v1776_v12, %v429_v2 }
  0xd9   : > { %v668_v61 = vadd.f32 %v612_v21, %v540_v27  ;;  %v669_v51 = vadd.f32 %v612_v21, %v541_v44  ;;  %v666_v52 = vadd.f32 %v607_v7, %v538_v62  ;;  %v667_v43 = vadd.f32 %v607_v7, %v539_v0 }
  0xda   : > { %v554_v33 = vmul.f32 %v1777_v58, %v426_v31  ;;  %v555_v24 = vmul.f32 %v1777_v58, %v427_v32 }
  0xdb   : > { %700 = vst [vmem:[%s1614_s10 + $0x70] sm:$0xff] %v668_v61  ;;  %701 = vst [vmem:[%s1614_s10 + $0x78] sm:$0xff] %v669_v51 }
  0xdc   : > { %698 = vst [vmem:[%s1614_s10 + $0x60] sm:$0xff] %v666_v52  ;;  %699 = vst [vmem:[%s1614_s10 + $0x68] sm:$0xff] %v667_v43  ;;  %v622_v13 = vpop.permute.xlu1 %621  ;;  %v617_v5 = vpop.permute.xlu0 %616 }
  0xdd   : > { %v672_v53 = vadd.f32 %v622_v13, %v544_v60  ;;  %v673_v47 = vadd.f32 %v622_v13, %v545_v9  ;;  %v670_v50 = vadd.f32 %v617_v5, %v542_v10  ;;  %v671_v56 = vadd.f32 %v617_v5, %v543_v11 }
  0xdf   : > { %704 = vst [vmem:[%s1614_s10 + $0x90] sm:$0xff] %v672_v53  ;;  %705 = vst [vmem:[%s1614_s10 + $0x98] sm:$0xff] %v673_v47 }
  0xe0   : > { %702 = vst [vmem:[%s1614_s10 + $0x80] sm:$0xff] %v670_v50  ;;  %703 = vst [vmem:[%s1614_s10 + $0x88] sm:$0xff] %v671_v56  ;;  %v632_v28 = vpop.permute.xlu1 %631  ;;  %v627_v23 = vpop.permute.xlu0 %626 }
  0xe1   : > { %v676_v63 = vadd.f32 %v632_v28, %v548_v17  ;;  %v677_v57 = vadd.f32 %v632_v28, %v549_v4  ;;  %v674_v54 = vadd.f32 %v627_v23, %v546_v18  ;;  %v675_v14 = vadd.f32 %v627_v23, %v547_v16 }
  0xe3   : > { %708 = vst [vmem:[%s1614_s10 + $0xb0] sm:$0xff] %v676_v63  ;;  %709 = vst [vmem:[%s1614_s10 + $0xb8] sm:$0xff] %v677_v57 }
  0xe4   : > { %706 = vst [vmem:[%s1614_s10 + $0xa0] sm:$0xff] %v674_v54  ;;  %707 = vst [vmem:[%s1614_s10 + $0xa8] sm:$0xff] %v675_v14  ;;  %v642_v34 = vpop.permute.xlu1 %641  ;;  %v637_v38 = vpop.permute.xlu0 %636 }
  0xe5   : > { %v680_v3 = vadd.f32 %v642_v34, %v552_v39  ;;  %v681_v15 = vadd.f32 %v642_v34, %v553_v40  ;;  %v678_v48 = vadd.f32 %v637_v38, %v550_v19  ;;  %v679_v6 = vadd.f32 %v637_v38, %v551_v20 }
  0xe7   : > { %712 = vst [vmem:[%s1614_s10 + $0xd0] sm:$0xff] %v680_v3  ;;  %713 = vst [vmem:[%s1614_s10 + $0xd8] sm:$0xff] %v681_v15 }
  0xe8   : > { %710 = vst [vmem:[%s1614_s10 + $0xc0] sm:$0xff] %v678_v48  ;;  %711 = vst [vmem:[%s1614_s10 + $0xc8] sm:$0xff] %v679_v6  ;;  %v652_v41 = vpop.permute.xlu1 %651  ;;  %v647_v25 = vpop.permute.xlu0 %646 }
  0xe9   : > { %v684_v27 = vadd.f32 %v652_v41, %v556_v49  ;;  %v685_v44 = vadd.f32 %v652_v41, %v557_v30  ;;  %v682_v62 = vadd.f32 %v647_v25, %v554_v33  ;;  %v683_v0 = vadd.f32 %v647_v25, %v555_v24 }
  0xeb   : > { %716 = vst [vmem:[%s1614_s10 + $0xf0] sm:$0xff] %v684_v27  ;;  %717 = vst [vmem:[%s1614_s10 + $0xf8] sm:$0xff] %v685_v44 }
  0xec   : > { %714 = vst [vmem:[%s1614_s10 + $0xe0] sm:$0xff] %v682_v62  ;;  %715 = vst [vmem:[%s1614_s10 + $0xe8] sm:$0xff] %v683_v0 }
  0xed   : > { %952 = shalt.err (!%p949_p6)
}
  0xee   : > { %s953_s6 = scalar_lea.hbm %s1709_s19, 4096  ;;  %s957_s8 = scalar_lea.hbm %s1766_s3, 8192 }
  0xef   : > { %p954_p7 = scmp.ne.s32.totalorder %s1709_s19, %s953_s6  ;;  %p958_p13 = scmp.lt.s32.totalorder %s1709_s19, %s1766_s3 }
  0xf0   : > { %p959_p2 = scmp.lt.s32.totalorder %s957_s8, %s953_s6 }
  0xf1   : > { %p955_p10 = pnand %p954_p7, %p1099_p9 }
  0xf2   : > { %p960_p8 = por %p959_p2, %p958_p13 }
  0xf3   : > { %p956_p4 = pneg %p955_p10 }
  0xf5   : > { %p961_p12 = pnand %p960_p8, %p956_p4 }
  0xf7   : > { %964 = shalt.err (!%p961_p12)
}
  0xf8   : > { %s1026_s10 = smov 256   ;;  %s1027_s29 = smov 16  }
  0xf9   : > { %840 = dma.vmem_to_hbm [thread:$0]  (%p1099_p9), %s1711_s11, 4096, %s1709_s19, %s719_s21, %s1026_s10, %s1026_s10, %s1027_s29  }
  0xfa PF: > { %s749_s15 = sand.u32 1, %s999_s12   ;;  %p1778_p0 = scmp.ge.s32.totalorder %s1019_s17, 2 }
  0xfb   : > { %s750_s18 = scalar_lea.sflag [#allocation4], %s749_s15 }
  0xfc   : > { %p847_p1 = pnand %p1778_p0, %p1106_p11 }
  0xfe   : > { %p848_p3 = pneg %p847_p1 }
 0x100   : > { %994 = dma.done.wait (%p848_p3), %s750_s18, 4096  }
 0x101   : > { %996 = vsyncadd (%p848_p3), %s750_s18, 4294963200  ;;  %s19_s17 = sadd.s32 1, %s1019_s17   ;;  %s1779_s12 = smov %s1003_s13 }
 0x102   : > { %p16_p5 = scmp.ge.s32.totalorder %s19_s17, 4   ;;  %s1780_s13 = smov %s1007_s14 }
 0x103   : > { %s1781_s14 = smov %s1104_s26  ;;  %s1782_s15 = smov %s1015_s16 }
 0x104   : > { %s1783_s16 = smov %s1785_s20  ;;  %18 = sbr.rel (!%p16_p5) target bundleno = 6 (0x6), region = 77 }
 0x109   :  { %755 = vsyncpa [#allocation3], 1 }
 0x10a   :  { %757 = vsyncpa [#allocation3 + $0x1], 1 }
 0x10b   :  { %758 = vsyncpa [#allocation4], 1 }
 0x10c   :  { %760 = vsyncpa [#allocation4 + $0x1], 1 }

</bundles_post_ra>
